<compile_context>
chip_gen: v7x
topology: tpu7x:2x2x1
jax: 0.10.0
libtpu: 0.0.40
codegen_flags: <defaults>
</compile_context>

<pallas_src>
import functools
import math

import jax
import jax.numpy as jnp
from jax.experimental import pallas as pl
from jax.experimental.pallas import tpu as pltpu


def _round_up(v: int, mult: int) -> int:
    return ((v + mult - 1) // mult) * mult


def _adapter_kernel(x_ref, w1_ref, b1_ref, w2_ref, o_ref):
    # x_ref:  (tm, c_in)   input rows (I/O dtype, e.g. f32 or bf16)
    # w1_ref: (c_in, Hp)   conv-folded, transposed, lane-padded linear1 weight
    # b1_ref: (1, Hp)      conv bias folded into a per-column bias (f32)
    # w2_ref: (Hp, Np)     transposed, lane-padded linear2 weight
    # o_ref:  (tm, Np)     output rows (Np multiple of 128 -> lane-dense stores)
    x = x_ref[...].astype(w1_ref.dtype)                         # bf16 MXU feed
    h = jnp.dot(x, w1_ref[...], preferred_element_type=jnp.float32)
    h = jnp.maximum(h + b1_ref[...], 0.0)                       # relu(linear1(conv(x)))
    out = jnp.dot(h.astype(w2_ref.dtype), w2_ref[...],
                  preferred_element_type=jnp.float32)
    o_ref[...] = jnp.maximum(out, 0.0).astype(o_ref.dtype)      # relu(linear2(.))


def prepare_adapter_params(conv_weight, conv_bias, linear1_weight, linear2_weight,
                           *, compute_dtype=jnp.bfloat16, lane=128):
    """One-time parameter prep (outside the per-token path).

    conv_weight: (1,1,1,1)  conv_bias: (1,)
    linear1_weight: (c_hid, c_in)   linear2_weight: (c_in, c_hid)   (PyTorch layout)
    compute_dtype: MXU feed dtype for the weights (bf16 recommended; f32 for
                   bit-tight parity with an all-f32 reference).
    Returns (w1_eff, bias1, w2_t) ready for adapter_forward.
    """
    c_hid, c_in = linear1_weight.shape
    assert linear2_weight.shape == (c_in, c_hid)
    hp = _round_up(c_hid, lane)      # padded hidden dim
    n_out = _round_up(c_in, lane)    # padded output dim (lane-dense stores)

    scale = conv_weight.reshape(()).astype(jnp.float32)   # 1x1 conv, 1->1 channel
    shift = conv_bias.reshape(()).astype(jnp.float32)

    w1_t = jnp.zeros((c_in, hp), jnp.float32).at[:, :c_hid].set(
        linear1_weight.T.astype(jnp.float32))
    # Fold conv (y = scale*x + shift) into linear1:
    #   y @ W1^T = x @ (scale * W1^T) + shift * colsum(W1^T)
    w1_eff = (scale * w1_t).astype(compute_dtype)
    bias1 = (shift * jnp.sum(w1_t, axis=0)).reshape(1, hp).astype(jnp.float32)

    # Padded columns/rows are zero -> slicing the output back to c_in is exact.
    w2_t = jnp.zeros((hp, n_out), jnp.float32).at[:c_hid, :c_in].set(
        linear2_weight.T.astype(jnp.float32)).astype(compute_dtype)
    return w1_eff, bias1, w2_t


@functools.partial(
    jax.jit,
    static_argnames=("tm", "vmem_limit_bytes", "x_buffers", "weight_buffers"))
def adapter_forward(x, w1_eff, bias1, w2_t, *, tm=512, vmem_limit_bytes=None,
                    x_buffers=2, weight_buffers=1):
    """Adapter forward (k=2, eval mode). x: (..., c_in) -> (..., c_in).

    tm: rows per grid step. 512 is a good default everywhere; 1024 works on v6e
        (128 MiB VMEM). Tiny batches are clamped to a smaller aligned tile that
        still produces >= 2 grid steps so both TensorCores get work.
    vmem_limit_bytes: scoped VMEM limit; if None it is sized from the footprint
        and clamped to 60 MiB (safe on v7x's 64 MiB physical VMEM).
    x_buffers: pipeline depth for the streaming x/out blocks (3 can help hide
        per-step DMA latency when compute per tile is very short).
    weight_buffers: 1 keeps the resident weights single-buffered.

    For an HBM-bound workload, passing x (and consuming the output) in bf16
    halves HBM traffic end-to-end.
    """
    *lead, c_in = x.shape
    hp = w1_eff.shape[1]
    n_out = w2_t.shape[1]
    assert w1_eff.shape[0] == c_in and bias1.shape == (1, hp) and w2_t.shape[0] == hp

    m = math.prod(lead) if lead else 1
    x2d = x.reshape(m, c_in)

    # Sublane granule per dtype (f32: 8, bf16: 16, int8/fp8: 32).
    itemsize = jnp.dtype(x.dtype).itemsize
    granule = {4: 8, 2: 16, 1: 32}.get(itemsize, 8)
    tm_eff = max(granule, min(_round_up(tm, granule), _round_up(m, granule)))
    if m >= 2 * granule:
        # Ensure at least two grid steps so the "parallel" M axis can feed both
        # TensorCores (megacore / v7x).
        tm_eff = min(tm_eff, _round_up(pl.cdiv(m, 2), granule))
    grid = (pl.cdiv(m, tm_eff),)   # ragged last block is masked by Pallas

    if vmem_limit_bytes is None:
        w_bytes = jnp.dtype(w1_eff.dtype).itemsize
        buf_io = x_buffers * tm_eff * (c_in + n_out) * itemsize       # x + out blocks
        wts = weight_buffers * ((c_in * hp + hp * n_out) * w_bytes + hp * 4)
        interm = tm_eff * (hp + n_out) * 4                            # f32 intermediates
        est = int(1.5 * (buf_io + wts + interm)) + (8 << 20)          # headroom
        vmem_limit_bytes = max(32 << 20, min(est, 60 << 20))

    io_mode = pl.Buffered(x_buffers) if x_buffers != 2 else None
    w_mode = pl.Buffered(weight_buffers) if weight_buffers != 2 else None

    out2d = pl.pallas_call(
        _adapter_kernel,
        out_shape=jax.ShapeDtypeStruct((m, n_out), x.dtype),
        grid_spec=pltpu.PrefetchScalarGridSpec(
            num_scalar_prefetch=0,
            grid=grid,
            in_specs=[
                # x rows, tiled on M (streamed)
                pl.BlockSpec((tm_eff, c_in), lambda i: (i, 0), pipeline_mode=io_mode),
                # Weights: constant index_map -> stay resident in VMEM.
                pl.BlockSpec((c_in, hp), lambda i: (0, 0), pipeline_mode=w_mode),
                pl.BlockSpec((1, hp), lambda i: (0, 0), pipeline_mode=w_mode),
                pl.BlockSpec((hp, n_out), lambda i: (0, 0), pipeline_mode=w_mode),
            ],
            out_specs=pl.BlockSpec((tm_eff, n_out), lambda i: (i, 0),
                                   pipeline_mode=io_mode),
        ),
        compiler_params=pltpu.CompilerParams(
            dimension_semantics=("parallel",),
            vmem_limit_bytes=vmem_limit_bytes),
    )(x2d, w1_eff, bias1, w2_t)

    # Padded W2 columns are zero, so dropping them is exact (no-op when c_in%128==0).
    out = out2d if n_out == c_in else out2d[:, :c_in]
    return out.reshape(*lead, c_in)


if __name__ == "__main__":
    # Small shapes consistent with the module: batch=2, seq=8, c_in=32, reduction=4.
    B, S, C_IN, REDUCTION = 2, 8, 32, 4
    C_HID = C_IN // REDUCTION

    key = jax.random.PRNGKey(0)
    kx, k1, k2, kcw, kcb = jax.random.split(key, 5)

    # nn.Linear default init: U(-1/sqrt(fan_in), 1/sqrt(fan_in)); Conv2d(1,1,1): bound=1.
    b1 = 1.0 / (C_IN ** 0.5)
    b2 = 1.0 / (C_HID ** 0.5)
    w1 = jax.random.uniform(k1, (C_HID, C_IN), jnp.float32, -b1, b1)   # linear1.weight
    w2 = jax.random.uniform(k2, (C_IN, C_HID), jnp.float32, -b2, b2)   # linear2.weight
    conv_w = jax.random.uniform(kcw, (1, 1, 1, 1), jnp.float32, -1.0, 1.0)
    conv_b = jax.random.uniform(kcb, (1,), jnp.float32, -1.0, 1.0)

    x = jax.random.normal(kx, (B, S, C_IN), jnp.float32)

    # Pure-JAX reference mirroring the PyTorch forward (k=2, dropout in eval mode).
    y = conv_w.reshape(()) * x + conv_b.reshape(())
    h = jnp.maximum(y @ w1.T, 0.0)
    ref = jnp.maximum(h @ w2.T, 0.0)

    # 1) exact f32 path (tight tolerance)
    params_f32 = prepare_adapter_params(conv_w, conv_b, w1, w2,
                                        compute_dtype=jnp.float32)
    out_f32 = jax.block_until_ready(adapter_forward(x, *params_f32))
    assert out_f32.shape == (B, S, C_IN)
    err_f32 = float(jnp.max(jnp.abs(out_f32 - ref)))
    assert jnp.allclose(out_f32, ref, atol=2e-4, rtol=2e-4), f"f32 max abs err = {err_f32}"

    # 2) default bf16 MXU path (bf16 rounding tolerance)
    params_bf16 = prepare_adapter_params(conv_w, conv_b, w1, w2)
    out_bf16 = jax.block_until_ready(adapter_forward(x, *params_bf16))
    assert out_bf16.shape == (B, S, C_IN)
    err_bf16 = float(jnp.max(jnp.abs(out_bf16 - ref)))
    assert jnp.allclose(out_bf16, ref, atol=5e-2, rtol=5e-2), f"bf16 max abs err = {err_bf16}"

    print("KERNEL_OK")
</pallas_src>

<mosaic_0001>
module attributes {stable_mosaic.version = 11 : i64} {
  func.func @_adapter_kernel(%arg0: i32, %arg1: memref<8x32xf32, #tpu.memory_space<vmem>>, %arg2: memref<32x128xf32, #tpu.memory_space<vmem>>, %arg3: memref<1x128xf32, #tpu.memory_space<vmem>>, %arg4: memref<128x128xf32, #tpu.memory_space<vmem>>, %arg5: memref<8x128xf32, #tpu.memory_space<vmem>>) attributes {dimension_semantics = [#tpu.dimension_semantics<parallel>], iteration_bounds = array<i64: 2>, scalar_prefetch = 0 : i64, scratch_operands = 0 : i64, tpu.core_type = #tpu.core_type<tc>, window_params = [{transform_indices = @transform_0, window_bounds = array<i64: 8, 32>}, {pipeline_mode = #tpu.pipeline_mode<synchronous>, transform_indices = @transform_1, window_bounds = array<i64: 32, 128>}, {pipeline_mode = #tpu.pipeline_mode<synchronous>, transform_indices = @transform_2, window_bounds = array<i64: 1, 128>}, {pipeline_mode = #tpu.pipeline_mode<synchronous>, transform_indices = @transform_3, window_bounds = array<i64: 128, 128>}, {transform_indices = @transform_4, window_bounds = array<i64: 8, 128>}]} {
    %c0 = arith.constant 0 : index
    %c0_0 = arith.constant 0 : index
    %0 = vector.load %arg1[%c0, %c0_0] : memref<8x32xf32, #tpu.memory_space<vmem>>, vector<8x32xf32>
    %c0_1 = arith.constant 0 : index
    %c0_2 = arith.constant 0 : index
    %1 = vector.load %arg2[%c0_1, %c0_2] : memref<32x128xf32, #tpu.memory_space<vmem>>, vector<32x128xf32>
    %cst = arith.constant dense<0.000000e+00> : vector<8x128xf32>
    %2 = tpu.matmul %0, %1, %cst {dimension_numbers = #tpu.dot_dimension_numbers<[1], [0], [0], [1], [0, 0, 1, 1], [], []>} : vector<8x32xf32>, vector<32x128xf32>, vector<8x128xf32> -> vector<8x128xf32>
    %c0_3 = arith.constant 0 : index
    %c0_4 = arith.constant 0 : index
    %3 = vector.load %arg3[%c0_3, %c0_4] : memref<1x128xf32, #tpu.memory_space<vmem>>, vector<1x128xf32>
    %4 = vector.broadcast %3 : vector<1x128xf32> to vector<8x128xf32>
    %5 = arith.addf %2, %4 : vector<8x128xf32>
    %cst_5 = arith.constant 0.000000e+00 : f32
    %6 = vector.broadcast %cst_5 : f32 to vector<8x128xf32>
    %7 = arith.maximumf %5, %6 : vector<8x128xf32>
    %c0_6 = arith.constant 0 : index
    %c0_7 = arith.constant 0 : index
    %8 = vector.load %arg4[%c0_6, %c0_7] : memref<128x128xf32, #tpu.memory_space<vmem>>, vector<128x128xf32>
    %cst_8 = arith.constant dense<0.000000e+00> : vector<8x128xf32>
    %9 = tpu.matmul %7, %8, %cst_8 {dimension_numbers = #tpu.dot_dimension_numbers<[1], [0], [0], [1], [0, 0, 1, 1], [], []>} : vector<8x128xf32>, vector<128x128xf32>, vector<8x128xf32> -> vector<8x128xf32>
    %cst_9 = arith.constant 0.000000e+00 : f32
    %10 = vector.broadcast %cst_9 : f32 to vector<8x128xf32>
    %11 = arith.maximumf %9, %10 : vector<8x128xf32>
    %c0_10 = arith.constant 0 : index
    %c0_11 = arith.constant 0 : index
    %12 = vector.load %arg5[%c0_10, %c0_11] : memref<8x128xf32, #tpu.memory_space<vmem>>, vector<8x128xf32>
    tpu.vector_store %arg5[%c0_10, %c0_11], %11 {strides = array<i32>} : memref<8x128xf32, #tpu.memory_space<vmem>>, vector<8x128xf32>,
    return
  }
  func.func @transform_0(%arg0: i32) -> (i32, i32) {
    %c0_i32 = arith.constant 0 : i32
    %c0_i32_0 = arith.constant 0 : i32
    return %arg0, %c0_i32 : i32, i32
  }
  func.func @transform_1(%arg0: i32) -> (i32, i32) {
    %c0_i32 = arith.constant 0 : i32
    %c0_i32_0 = arith.constant 0 : i32
    %c0_i32_1 = arith.constant 0 : i32
    return %c0_i32, %c0_i32_0 : i32, i32
  }
  func.func @transform_2(%arg0: i32) -> (i32, i32) {
    %c0_i32 = arith.constant 0 : i32
    %c0_i32_0 = arith.constant 0 : i32
    %c0_i32_1 = arith.constant 0 : i32
    return %c0_i32, %c0_i32_0 : i32, i32
  }
  func.func @transform_3(%arg0: i32) -> (i32, i32) {
    %c0_i32 = arith.constant 0 : i32
    %c0_i32_0 = arith.constant 0 : i32
    %c0_i32_1 = arith.constant 0 : i32
    return %c0_i32, %c0_i32_0 : i32, i32
  }
  func.func @transform_4(%arg0: i32) -> (i32, i32) {
    %c0_i32 = arith.constant 0 : i32
    %c0_i32_0 = arith.constant 0 : i32
    return %arg0, %c0_i32 : i32, i32
  }
}

</mosaic_0001>

<bundles_post_ra>
// kernel: adapter_forward.1
= control target key start
LH: loop header
LB: loop body
LE: loop exit
PB: predicated region body
PF: predicated region fallthrough
CT: control target
= control target key end

     0   :  { %9 = vsyncpa [#allocation3], 0  ;;  %s1019_s0 = inlined_call_operand.hbm [shape: f32[16,32], index: 0, kind: input, shape index: {}]   ;;  %s1020_s1 = inlined_call_operand.hbm [shape: f32[32,128], index: 1, kind: input, shape index: {}]   ;;  %s1021_s2 = inlined_call_operand.vmem [shape: f32[1,128], index: 2, kind: input, shape index: {}]   ;;  %s1022_s3 = inlined_call_operand.hbm [shape: f32[128,128], index: 3, kind: input, shape index: {}]   ;;  %s1023_s4 = inlined_call_operand.vmem [shape: f32[16,128], index: 4, kind: output, shape index: {}]  }
   0x1   :  { %11 = vsyncpa [#allocation3 + $0x1], 0 }
   0x2   :  { %12 = vsyncpa [#allocation5], 0  ;;  %s839_s15 = smov 0   ;;  %s841_s16 = smov 0  }
   0x3   :  { %s843_s17 = smov 0   ;;  %s845_s18 = smov 0  }
   0x4 LB: > { %s858_s19 = sadd.s32 4294967295, %s804_s18   ;;  %p38_p0 = scmp.ne.s32.totalorder %s796_s16, %s792_s15  ;;  %s804_s18 = sphi %s845_s18, %s1038_s18   ;;  %s800_s17 = sphi %s843_s17, %s1037_s17   ;;  %s796_s16 = sphi %s841_s16, %s1036_s16   ;;  %s792_s15 = sphi %s839_s15, %s1035_s15  }
   0x5   : > { %p1024_p1 = scmp.eq.s32.totalorder %s858_s19, 0  ;;  %p502_p2 = scmp.ge.s32.totalorder %s804_s18, 1 }
   0x6   : > { %p138_p3 = scmp.lt.s32.totalorder %s804_s18, 3  ;;  %s806_s22 = smov [#allocation4]  }
   0x7   : > { %p866_p4 = por %p1024_p1, %p38_p0  ;;  %s150_s23 = sshll.u32 %s806_s22, 4  ;;  %s151_s23 = int_to_ptr.vmem [resolvable:$true] %s150_s23 }
   0x8   : > { %p870_p5 = pnand %p502_p2, %p138_p3  ;;  %s807_s25 = smov [#allocation6]  }
   0x9   : > { %s1027_s20 = scalar_select %p866_p4, 1, 0 }
   0xa   : > { %s1028_s21 = scalar_select %p870_p5, 1, 0 }
   0xb   : > { %p625_p6 = pneg %p870_p5  ;;  %s166_s26 = sshll.u32 %s807_s25, 4  ;;  %s882_s26 = int_to_ptr.vmem [resolvable:$true] %s166_s26 }
   0xc   : > { %s680_s29 = scalar_lea.hbm %s1020_s1, 512 }
   0xd   : > { %p878_p7 = pnand %p625_p6, %p1024_p1  ;;  %p681_p8 = scmp.ne.s32.totalorder %s1020_s1, %s680_s29 }
   0xe   : > { %p687_p12 = scmp.lt.u32.totalorder %s680_s29, %s1020_s1 }
   0xf   : > { %p682_p9 = pneg %p878_p7 }
  0x11   : > { %p683_p10 = pnand %p682_p9, %p681_p8 }
  0x13   : > { %p684_p11 = pneg %p683_p10 }
  0x15   : > { %p689_p13 = pnand %p687_p12, %p684_p11 }
  0x17   : > { %692 = shalt.err (!%p689_p13)
}
  0x18   : > { %s693_s8 = scalar_lea.vmem %s151_s23, 512  ;;  %p701_p6 = scmp.lt.s32.totalorder %s151_s23, %s151_s23 }
  0x19   : > { %p694_p0 = scmp.ne.s32.totalorder %s151_s23, %s693_s8  ;;  %p702_p1 = scmp.lt.s32.totalorder %s693_s8, %s693_s8 }
  0x1b   : > { %p696_p2 = pnand %p694_p0, %p682_p9  ;;  %p703_p4 = por %p702_p1, %p701_p6 }
  0x1d   : > { %p697_p3 = pneg %p696_p2 }
  0x1f   : > { %p704_p5 = pnand %p703_p4, %p697_p3 }
  0x21   : > { %707 = shalt.err (!%p704_p5)
}
  0x22   : > { %s808_s9 = smov 128   ;;  %s809_s10 = smov 8  }
  0x23   : > { %628 = dma.hbm_to_vmem [thread:$0]  (!%p878_p7), %s1020_s1, 512, %s151_s23, [#allocation5], %s808_s9, %s808_s9, %s809_s10  }
  0x24   : > { %s708_s15 = scalar_lea.hbm %s1022_s3, 2048 }
  0x25   : > { %p709_p8 = scmp.ne.s32.totalorder %s1022_s3, %s708_s15  ;;  %p715_p5 = scmp.lt.u32.totalorder %s708_s15, %s1022_s3 }
  0x27   : > { %p711_p1 = pnand %p709_p8, %p682_p9 }
  0x29   : > { %p712_p4 = pneg %p711_p1 }
  0x2b   : > { %p717_p10 = pnand %p715_p5, %p712_p4 }
  0x2d   : > { %720 = shalt.err (!%p717_p10)
}
  0x2e   : > { %s721_s23 = scalar_lea.vmem %s882_s26, 2048  ;;  %p729_p0 = scmp.lt.s32.totalorder %s882_s26, %s882_s26 }
  0x2f   : > { %p722_p11 = scmp.ne.s32.totalorder %s882_s26, %s721_s23  ;;  %p730_p2 = scmp.lt.s32.totalorder %s721_s23, %s721_s23 }
  0x31   : > { %p724_p12 = pnand %p722_p11, %p682_p9  ;;  %p731_p3 = por %p730_p2, %p729_p0 }
  0x33   : > { %p725_p13 = pneg %p724_p12 }
  0x35   : > { %p732_p6 = pnand %p731_p3, %p725_p13 }
  0x37   : > { %735 = shalt.err (!%p732_p6)
}
  0x38   : > { %631 = dma.hbm_to_vmem [thread:$0]  (!%p878_p7), %s1022_s3, 2048, %s882_s26, [#allocation5], %s808_s9, %s808_s9, %s809_s10  }
  0x39   : > { %s932_s5 = sadd.s32 1, %s804_s18   ;;  %s25_s6 = sadd.s32 1, %s800_s17 }
  0x3a   : > { %s22_s24 = ssub.s32 %s804_s18, %s932_s5  ;;  %p32_p9 = scmp.ne.s32.totalorder %s800_s17, %s796_s16 }
  0x3b   : > { %p23_p8 = scmp.eq.s32.totalorder %s22_s24, 0  ;;  %p33_p1 = scmp.eq.s32.totalorder %s804_s18, 0 }
  0x3c   : > { %p638_p4 = scmp.lt.s32.totalorder %s804_s18, 2  ;;  %s180_s7 = sand.u32 1, %s800_s17  }
  0x3d   : > { %s943_s8 = scalar_select %p23_p8, %s800_s17, %s25_s6  }
  0x3e   : > { %p34_p5 = por %p33_p1, %p32_p9  ;;  %s506_s11 = sshll.u32 %s180_s7, 3 }
  0x3f   : > { %s507_s12 = sshll.u32 %s804_s18, 7  ;;  %s184_s26 = scalar_lea.vmem [#allocation2], %s506_s11 }
  0x40   : > { %s949_s15 = scalar_lea.hbm %s1019_s0, %s507_s12  ;;  %s191_s9 = sshll.u32 %s184_s26, 4  ;;  %s955_s9 = int_to_ptr.vmem [resolvable:$true] %s191_s9 }
  0x41   : > { %p951_p7 = pnand %p638_p4, %p34_p5  ;;  %s181_s18 = scalar_lea.sflag [#allocation3], %s180_s7 }
  0x42   : > { %s736_s22 = scalar_lea.hbm %s949_s15, 128  ;;  %s741_s28 = scalar_lea.hbm %s1019_s0, 256 }
  0x43   : > { %p737_p10 = scmp.ne.s32.totalorder %s949_s15, %s736_s22  ;;  %p738_p11 = pneg %p951_p7 }
  0x44   : > { %p742_p0 = scmp.lt.u32.totalorder %s949_s15, %s1019_s0  ;;  %p743_p2 = scmp.lt.u32.totalorder %s741_s28, %s736_s22 }
  0x45   : > { %p739_p12 = pnand %p738_p11, %p737_p10  ;;  %p745_p6 = scmp.lt.u32.totalorder %s736_s22, %s949_s15 }
  0x46   : > { %p744_p3 = por %p743_p2, %p742_p0 }
  0x47   : > { %p740_p13 = pneg %p739_p12 }
  0x48   : > { %p746_p9 = por %p745_p6, %p744_p3 }
  0x4a   : > { %p747_p8 = pnand %p746_p9, %p740_p13 }
  0x4c   : > { %750 = shalt.err (!%p747_p8)
}
  0x4d   : > { %s751_s30 = scalar_lea.vmem %s955_s9, 128  ;;  %s810_s6 = smov [#allocation2]  }
  0x4e   : > { %p752_p1 = scmp.ne.s32.totalorder %s955_s9, %s751_s30  ;;  %s756_s24 = sshll.u32 %s810_s6, 4  ;;  %s757_s24 = int_to_ptr.vmem [resolvable:$false] %s756_s24 }
  0x4f   : > { %s758_s7 = scalar_lea.vmem %s757_s24, 256  ;;  %p759_p10 = scmp.lt.s32.totalorder %s955_s9, %s757_s24 }
  0x50   : > { %p754_p4 = pnand %p752_p1, %p738_p11  ;;  %p760_p12 = scmp.lt.s32.totalorder %s758_s7, %s751_s30 }
  0x52   : > { %p755_p5 = pneg %p754_p4  ;;  %p761_p0 = por %p760_p12, %p759_p10 }
  0x54   : > { %p762_p2 = pnand %p761_p0, %p755_p5 }
  0x56   : > { %765 = shalt.err (!%p762_p2)
}
  0x57   : > { %635 = dma.hbm_to_vmem [thread:$0]  (!%p951_p7), %s949_s15, 128, %s955_s9, %s181_s18  }
  0x58   : > { %p1031_p13 = scmp.ne.s32.totalorder %s1028_s21, 0 }
  0x59   : > { %s202_s11 = sand.u32 (!%p1031_p13), 1, %s796_s16   ;;  %p1032_p11 = scmp.ne.s32.totalorder (!%p1031_p13), %s1027_s20, 0 }
  0x5a   : > { %200 = sbr.rel (%p1031_p13) target bundleno = 542 (0x21e), region = 36  ;;  %s985_s12 = sshll.u32 (!%p1031_p13), %s202_s11, 3 }
  0x5b   : > { %s203_s13 = scalar_lea.sflag (!%p1031_p13), [#allocation3], %s202_s11  ;;  %s206_s14 = scalar_lea.vmem (!%p1031_p13), [#allocation2], %s985_s12 }
  0x61   : > { %783 = dma.done.wait (%p1032_p11), %s203_s13, 128  }
  0x62   : > { %785 = vsyncadd (%p1032_p11), %s203_s13, 4294967168  ;;  %p1033_p3 = scmp.eq.s32.totalorder %s858_s19, 0 }
  0x64   : > { %787 = dma.done.wait (%p1033_p3), [#allocation5], 2560   ;;  %p1034_p7 = pmov %p1033_p3 }
  0x65   : > { %v811_v0 = vmov 0.0|0.0   ;;  %vm812_vm0 = vmmov 0   ;;  %v813_v1 = vmov 0.0   ;;  %v243_v2 = vld [vmem:[#allocation4] sm:$0xff]  ;;  %v244_v3 = vld [vmem:[#allocation4 + $0x8] sm:$0xff]  ;;  %v245_v4 = vld [vmem:[#allocation4 + $0x10] sm:$0xff] }
  0x66   : > { %789 = vsyncadd (%p1034_p7), [#allocation5], 4294964736  ;;  %585 = vmatprep.subr.bf16.mxu0 %v811_v0  ;;  %547 = vmatprep.mubr.msk.f32.mxu0 %vm812_vm0, %v813_v1  ;;  %v586_v5 = vpack.c.bf16 %v244_v3, %v243_v2  ;;  %v246_v6 = vld [vmem:[#allocation4 + $0x18] sm:$0xff]  ;;  %v329_v7 = vld [vmem:[#allocation6] sm:$0xff]  ;;  %vm254_vm1 = vcmask 261120   ;;  %p238_p6 = scmp.lt.s32.totalorder %s858_s19, 1 }
  0x67   : > { %591 = vmatprep.subr.bf16.mxu1 %v811_v0  ;;  %582 = vmatprep.mubr.msk.f32.mxu1 %vm812_vm0, %v813_v1  ;;  %v330_v8 = vld [vmem:[#allocation6 + $0x8] sm:$0xff]  ;;  %v331_v9 = vld [vmem:[#allocation6 + $0x10] sm:$0xff]  ;;  %v332_v10 = vld [vmem:[#allocation6 + $0x18] sm:$0xff]  ;;  %v589_v11 = vpack.c.bf16 %v246_v6, %v245_v4 }
  0x68   : > { %587 = vmatpush3.bf16.msra.mxu0 %v586_v5  ;;  %v592_v12 = vpack.c.bf16 %v330_v8, %v329_v7  ;;  %v595_v13 = vpack.c.bf16 %v332_v10, %v331_v9  ;;  %v333_v14 = vld [vmem:[#allocation6 + $0x20] sm:$0xff]  ;;  %v334_v15 = vld [vmem:[#allocation6 + $0x28] sm:$0xff]  ;;  %v242_v16 = vld [vmem:[%s206_s14] sm:$0xff]  ;;  %s1040_s19 = smov (!%p238_p6, %s858_s19), 1 }
  0x69   : > { %588 = vmatprep.subr.bf16.mxu0 %v811_v0  ;;  %v598_v17 = vpack.c.bf16 %v334_v15, %v333_v14  ;;  %v335_v18 = vld [vmem:[#allocation6 + $0x30] sm:$0xff]  ;;  %v336_v19 = vld [vmem:[#allocation6 + $0x38] sm:$0xff]  ;;  %v337_v21 = vld [vmem:[#allocation6 + $0x40] sm:$0xff]  ;;  %s512_s15 = sshll.u32 %s1040_s19, 3 }
  0x6a   : > { %593 = vmatpush3.bf16.msra.mxu1 %v592_v12  ;;  %v601_v20 = vpack.c.bf16 %v336_v19, %v335_v18  ;;  %v338_v22 = vld [vmem:[#allocation6 + $0x48] sm:$0xff]  ;;  %v339_v24 = vld [vmem:[#allocation6 + $0x50] sm:$0xff]  ;;  %v340_v25 = vld [vmem:[#allocation6 + $0x58] sm:$0xff]  ;;  %s241_s10 = scalar_lea.vmem %s1023_s4, %s512_s15 }
  0x6b   : > { %594 = vmatprep.subr.bf16.mxu1 %v811_v0  ;;  %v604_v23 = vpack.c.bf16 %v338_v22, %v337_v21  ;;  %v607_v26 = vpack.c.bf16 %v340_v25, %v339_v24  ;;  %v341_v27 = vld [vmem:[#allocation6 + $0x60] sm:$0xff]  ;;  %v342_v28 = vld [vmem:[#allocation6 + $0x68] sm:$0xff]  ;;  %v343_v30 = vld [vmem:[#allocation6 + $0x70] sm:$0xff] }
  0x6c   : > { %590 = vmatpush3.bf16.msra.mxu0 %v589_v11  ;;  %v610_v29 = vpack.c.bf16 %v342_v28, %v341_v27  ;;  %v344_v31 = vld [vmem:[#allocation6 + $0x78] sm:$0xff]  ;;  %v513_v33 = vld [vmem:[%s1021_s2] ss:$0 sm:$0xff] }
  0x6d   : > { %v613_v32 = vpack.c.bf16 %v344_v31, %v343_v30 }
  0x6e   : > { %596 = vmatpush3.bf16.msra.mxu1 %v595_v13 }
  0x6f   : > { %548 = vmatmul.mubr.msk.f32.vlgmr.msra.gmra.mrb[0].mxu0 %vm254_vm1, %v242_v16  ;;  %597 = vmatprep.subr.bf16.mxu1 %v811_v0 }
  0x72   : > { %599 = vmatpush3.bf16.msra.mxu1 %v598_v17 }
  0x73   : > { %600 = vmatprep.subr.bf16.mxu1 %v811_v0 }
  0x76   : > { %602 = vmatpush3.bf16.msra.mxu1 %v601_v20 }
  0x77   : > { %603 = vmatprep.subr.bf16.mxu1 %v811_v0 }
  0x7a   : > { %605 = vmatpush3.bf16.msra.mxu1 %v604_v23 }
  0x7b   : > { %606 = vmatprep.subr.bf16.mxu1 %v811_v0 }
  0x7e   : > { %608 = vmatpush3.bf16.msra.mxu1 %v607_v26 }
  0x7f   : > { %609 = vmatprep.subr.bf16.mxu1 %v811_v0 }
  0x82   : > { %611 = vmatpush3.bf16.msra.mxu1 %v610_v29 }
  0x83   : > { %612 = vmatprep.subr.bf16.mxu1 %v811_v0 }
  0x86   : > { %614 = vmatpush3.bf16.msra.mxu1 %v613_v32 }
 0x142   : > { %v324_v34 = vpop.f32.mrb[0].mxu0 }
 0x143   : > { %v325_v35 = vadd.f32 %v513_v33, %v324_v34  ;;  %v549_v36 = vpop.f32.mrb[1].mxu0 }
 0x145   : > { %v328_v37 = vmax.f32 %v325_v35, 0.0 }
 0x147   : > { %583 = vmatmul.mubr.f32.vlgmr.msra.gmra.mrb[0].mxu1 %v328_v37 }
 0x21a   : > { %v411_v38 = vpop.f32.mrb[0].mxu1 }
 0x21b   : > { %v415_v39 = vmax.f32 %v411_v38, 0.0  ;;  %v584_v40 = vpop.f32.mrb[1].mxu1 }
 0x21d   : > { %416 = vst [vmem:[%s241_s10] sm:$0xff] %v415_v39 }
 0x21e PF: > { %p15_p9 = scmp.ge.s32.totalorder %s932_s5, 4   ;;  %s1035_s15 = smov %s796_s16 }
 0x21f   : > { %s1036_s16 = smov %s800_s17  ;;  %s1037_s17 = smov %s943_s8 }
 0x220   : > { %s1038_s18 = smov %s932_s5  ;;  %17 = sbr.rel (!%p15_p9) target bundleno = 4 (0x4), region = 84 }
 0x227   :  { %436 = vsyncpa [#allocation3], 1 }
 0x228   :  { %438 = vsyncpa [#allocation3 + $0x1], 1 }
 0x229   :  { %439 = vsyncpa [#allocation5], 1 }

</bundles_post_ra>
